<compile_context>
chip_gen: v7x
topology: tpu7x:2x2x1
jax: 0.10.0
libtpu: 0.0.40
codegen_flags: <defaults>
</compile_context>

<pallas_src>
import math

import jax
import jax.numpy as jnp
from jax.experimental import pallas as pl
from jax.experimental.pallas import tpu as pltpu


# ----------------------------------------------------------------------------
# helpers
# ----------------------------------------------------------------------------
def _round_up(x, m):
    return (x + m - 1) // m * m


def _pick_tile(total, max_tile, align):
    """Largest divisor of `total` that is a multiple of `align` and <= max_tile.

    `total` is assumed to be a multiple of `align`."""
    t = min(total, max_tile)
    t = (t // align) * align
    while total % t != 0:
        t -= align
    return t


# ----------------------------------------------------------------------------
# Pallas kernels: retinal resampling as a matmul on the MXU.
# ----------------------------------------------------------------------------
def _retinal_matmul_single_kernel(x_ref, w_ref, o_ref):
    # Whole-K matmul; one lane-dense output tile per grid step.
    o_ref[...] = jnp.dot(
        x_ref[...], w_ref[...], preferred_element_type=jnp.float32
    ).astype(o_ref.dtype)


def _retinal_matmul_acc_kernel(x_ref, w_ref, o_ref, acc_ref):
    # K-tiled matmul with an f32 VMEM accumulator (grid = (M, P, K)).
    @pl.when(pl.program_id(2) == 0)
    def _():
        acc_ref[...] = jnp.zeros_like(acc_ref)

    acc_ref[...] += jnp.dot(
        x_ref[...], w_ref[...], preferred_element_type=jnp.float32
    )

    @pl.when(pl.program_id(2) == pl.num_programs(2) - 1)
    def _():
        o_ref[...] = acc_ref[...].astype(o_ref.dtype)


def retinal_sample_pallas(x_flat, samp_mat_t, *, tm_max=256, tk_max=512,
                          tn_max=512, out_dtype=jnp.float32):
    """x_flat: [M, HW]; samp_mat_t: [HW_pad, P_pad] bf16 (pre-padded, pre-transposed).

    Returns [M, P_pad]; caller slices the padded output columns."""
    M, HW = x_flat.shape
    HW_pad, P_pad = samp_mat_t.shape
    assert HW_pad % 128 == 0 and P_pad % 128 == 0 and HW_pad >= HW

    # Pad rows to a sublane multiple; cast image to bf16 (MXU-native input dtype).
    M_pad = _round_up(max(M, 8), 8)
    x_p = jnp.zeros((M_pad, HW_pad), jnp.bfloat16)
    x_p = x_p.at[:M, :HW].set(x_flat.astype(jnp.bfloat16))

    tn = _pick_tile(P_pad, tn_max, 128)

    if HW_pad <= tk_max and M_pad <= tm_max:
        # Small problem: whole image slab + whole weight column resident in
        # VMEM, no accumulator, grid = (P_pad // tn,)  -> a single invocation
        # at the default sizes (P_pad = 256 <= tn_max).
        p_steps = P_pad // tn
        out = pl.pallas_call(
            _retinal_matmul_single_kernel,
            out_shape=jax.ShapeDtypeStruct((M_pad, P_pad), out_dtype),
            grid_spec=pltpu.PrefetchScalarGridSpec(
                num_scalar_prefetch=0,
                grid=(p_steps,),
                in_specs=[
                    pl.BlockSpec((M_pad, HW_pad), lambda j: (0, 0)),
                    pl.BlockSpec((HW_pad, tn), lambda j: (0, j)),
                ],
                out_specs=pl.BlockSpec((M_pad, tn), lambda j: (0, j)),
            ),
            compiler_params=pltpu.CompilerParams(
                dimension_semantics=("parallel",),
            ),
        )(x_p, samp_mat_t)
        return out[:M]

    # Large problem: standard 3-axis tiled matmul with f32 accumulator.
    # Conservative tiles: 2x(tm,tk) bf16 + 2x(tk,tn) bf16 + (tm,tn) f32
    # stays well under the 64 MiB v7x VMEM and default scoped limits on
    # v5e / v6e; bump the scoped limit a little for headroom.
    tm = _pick_tile(M_pad, tm_max, 8)
    tk = _pick_tile(HW_pad, tk_max, 128)
    grid = (M_pad // tm, P_pad // tn, HW_pad // tk)
    out = pl.pallas_call(
        _retinal_matmul_acc_kernel,
        out_shape=jax.ShapeDtypeStruct((M_pad, P_pad), out_dtype),
        grid_spec=pltpu.PrefetchScalarGridSpec(
            num_scalar_prefetch=0,
            grid=grid,
            in_specs=[
                pl.BlockSpec((tm, tk), lambda i, j, k: (i, k)),
                pl.BlockSpec((tk, tn), lambda i, j, k: (k, j)),
            ],
            out_specs=pl.BlockSpec((tm, tn), lambda i, j, k: (i, j)),
            scratch_shapes=[pltpu.VMEM((tm, tn), jnp.float32)],
        ),
        compiler_params=pltpu.CompilerParams(
            dimension_semantics=("parallel", "parallel", "arbitrary"),
            vmem_limit_bytes=64 * 1024 * 1024,
        ),
    )(x_p, samp_mat_t)
    return out[:M]


# ----------------------------------------------------------------------------
# Log-polar bilinear sampling matrix (plain-JAX setup, built ONCE at init).
# ----------------------------------------------------------------------------
def _build_logpolar_sampling_matrix(
    image_H, image_W, retinal_H, retinal_W,
    r_min, r_max, l_t_xy, weight_s, weight_r,
    w_scale, w_rotation, log_r=True,
):
    # Learnable log-polar grid centred at l_t, radii scaled by weight_s*w_scale,
    # angles scaled by weight_r*w_rotation; bilinear sampling, zeros outside.
    if log_r:
        radii = jnp.exp(
            jnp.linspace(jnp.log(jnp.float32(r_min)),
                         jnp.log(jnp.float32(r_max)), retinal_H)
        )
    else:
        radii = jnp.linspace(jnp.float32(r_min), jnp.float32(r_max), retinal_H)
    radii = radii * weight_s * jnp.float32(w_scale)                     # [rH]
    thetas = (jnp.arange(retinal_W, dtype=jnp.float32) / retinal_W) \
        * jnp.float32(w_rotation) * weight_r                            # [rW]

    gx = l_t_xy[0] + radii[:, None] * jnp.cos(thetas)[None, :]          # [rH, rW]
    gy = l_t_xy[1] + radii[:, None] * jnp.sin(thetas)[None, :]

    # grid_sample, align_corners=True convention, zero padding outside.
    px = ((gx + 1.0) * 0.5 * (image_W - 1)).reshape(-1)
    py = ((gy + 1.0) * 0.5 * (image_H - 1)).reshape(-1)

    x0 = jnp.floor(px)
    y0 = jnp.floor(py)
    x1 = x0 + 1.0
    y1 = y0 + 1.0
    wx1 = px - x0
    wx0 = 1.0 - wx1
    wy1 = py - y0
    wy0 = 1.0 - wy1

    HW = image_H * image_W
    P = retinal_H * retinal_W
    rows = jnp.arange(P, dtype=jnp.int32)
    mat = jnp.zeros((P, HW), jnp.float32)
    corners = (
        (x0, y0, wx0 * wy0),
        (x1, y0, wx1 * wy0),
        (x0, y1, wx0 * wy1),
        (x1, y1, wx1 * wy1),
    )
    for xi, yi, wv in corners:
        valid = ((xi >= 0) & (xi <= image_W - 1) &
                 (yi >= 0) & (yi <= image_H - 1)).astype(jnp.float32)
        idx = (jnp.clip(yi, 0, image_H - 1).astype(jnp.int32) * image_W
               + jnp.clip(xi, 0, image_W - 1).astype(jnp.int32))
        mat = mat.at[rows, idx].add(wv * valid)    # O(P) scatter, not O(P*HW)
    return mat  # [P, HW]


# ----------------------------------------------------------------------------
# Module wrapper mirroring the PyTorch forward (test=True retinal path).
# ----------------------------------------------------------------------------
class ResNet18RetinalPallas:
    def __init__(self, in_channels=3, num_classes=100,
                 retinal_H=16, retinal_W=16, image_H=16, image_W=16, w_scale=1):
        self.in_channels = in_channels
        self.num_classes = num_classes
        self.retinal_H, self.retinal_W = retinal_H, retinal_W
        self.image_H, self.image_W = image_H, image_W
        self.w_scale = w_scale
        self.r_min, self.r_max = 0.01, 1.2
        self.w_rotation = 2.0 * math.pi
        # Learnable retinal parameters (module's retinal built with r=0.5, w_scale=1).
        self.weight_s = jnp.float32(0.5)
        self.weight_r = jnp.float32(1.0)

        # Sampling matrix depends only on (weight_s, weight_r, w_scale, shapes)
        # and on l_t, which is identically zero in the test path -> build and
        # cache it once (shared across the batch), pre-transposed / padded /
        # bf16-cast for the Pallas matmul.
        l_t0 = jnp.zeros((2,), jnp.float32)
        samp = _build_logpolar_sampling_matrix(
            self.image_H, self.image_W, self.retinal_H, self.retinal_W,
            self.r_min, self.r_max, l_t0, self.weight_s, self.weight_r,
            self.w_scale, self.w_rotation, log_r=True,
        )  # [P, HW] f32
        self._samp_f32 = samp
        HW = self.image_H * self.image_W
        P = self.retinal_H * self.retinal_W
        HW_pad = _round_up(HW, 128)
        P_pad = _round_up(P, 128)
        samp_t = jnp.zeros((HW_pad, P_pad), jnp.bfloat16)
        self._samp_t_padded = samp_t.at[:HW, :P].set(samp.T.astype(jnp.bfloat16))

    def forward(self, x, test=True, scale_compensate=(1, 1), img_org=None):
        # x: NCHW [B, C, H, W]
        B, C, H, W = x.shape
        assert H == self.image_H and W == self.image_W
        # l_t = zeros(B, 2) in the reference forward: the cached (l_t == 0)
        # sampling matrix is exact for every sample.  Per-sample / non-zero l_t
        # (training path) would need a per-sample matrix rebuild.
        P = self.retinal_H * self.retinal_W
        x_flat = x.reshape(B * C, H * W)
        i_t_flat = retinal_sample_pallas(x_flat, self._samp_t_padded)   # [B*C, P_pad]
        i_t = i_t_flat[:, :P].reshape(B, C, self.retinal_H, self.retinal_W)
        scale_ = None
        return i_t, [self.weight_s, self.weight_r, scale_]


if __name__ == "__main__":
    key = jax.random.PRNGKey(0)
    B, C, H, W = 2, 3, 16, 16
    x = jax.random.normal(key, (B, C, H, W), dtype=jnp.float32)

    model = ResNet18RetinalPallas(
        in_channels=C, retinal_H=16, retinal_W=16, image_H=H, image_W=W, w_scale=1
    )
    i_t, (weight_s, weight_r, scale_) = model.forward(x, test=True)
    jax.block_until_ready(i_t)

    # Reference: dense f32 matmul against the cached sampling matrix.
    ref = (x.reshape(B * C, H * W) @ model._samp_f32.T).reshape(B, C, 16, 16)
    max_err = float(jnp.max(jnp.abs(i_t - ref)))

    assert i_t.shape == (B, C, 16, 16)
    assert scale_ is None
    assert max_err < 0.25, f"max_err={max_err}"   # bf16-input matmul tolerance
    print("KERNEL_OK")
</pallas_src>

<mosaic_0001>
module attributes {stable_mosaic.version = 11 : i64} {
  func.func @_retinal_matmul_single_kernel(%arg0: i32, %arg1: memref<8x256xbf16, #tpu.memory_space<vmem>>, %arg2: memref<256x256xbf16, #tpu.memory_space<vmem>>, %arg3: memref<8x256xf32, #tpu.memory_space<vmem>>) attributes {dimension_semantics = [#tpu.dimension_semantics<parallel>], iteration_bounds = array<i64: 1>, scalar_prefetch = 0 : i64, scratch_operands = 0 : i64, tpu.core_type = #tpu.core_type<tc>, window_params = [{pipeline_mode = #tpu.pipeline_mode<synchronous>, transform_indices = @transform_0, window_bounds = array<i64: 8, 256>}, {transform_indices = @transform_1, window_bounds = array<i64: 256, 256>}, {transform_indices = @transform_2, window_bounds = array<i64: 8, 256>}]} {
    %c0 = arith.constant 0 : index
    %c0_0 = arith.constant 0 : index
    %0 = vector.load %arg1[%c0, %c0_0] : memref<8x256xbf16, #tpu.memory_space<vmem>>, vector<8x256xbf16>
    %c0_1 = arith.constant 0 : index
    %c0_2 = arith.constant 0 : index
    %1 = vector.load %arg2[%c0_1, %c0_2] : memref<256x256xbf16, #tpu.memory_space<vmem>>, vector<256x256xbf16>
    %cst = arith.constant dense<0.000000e+00> : vector<8x256xf32>
    %2 = tpu.matmul %0, %1, %cst {dimension_numbers = #tpu.dot_dimension_numbers<[1], [0], [0], [1], [0, 0, 1, 1], [], []>} : vector<8x256xbf16>, vector<256x256xbf16>, vector<8x256xf32> -> vector<8x256xf32>
    %c0_3 = arith.constant 0 : index
    %c0_4 = arith.constant 0 : index
    %3 = vector.load %arg3[%c0_3, %c0_4] : memref<8x256xf32, #tpu.memory_space<vmem>>, vector<8x256xf32>
    tpu.vector_store %arg3[%c0_3, %c0_4], %2 {strides = array<i32>} : memref<8x256xf32, #tpu.memory_space<vmem>>, vector<8x256xf32>,
    return
  }
  func.func @transform_0(%arg0: i32) -> (i32, i32) {
    %c0_i32 = arith.constant 0 : i32
    %c0_i32_0 = arith.constant 0 : i32
    %c0_i32_1 = arith.constant 0 : i32
    return %c0_i32, %c0_i32_0 : i32, i32
  }
  func.func @transform_1(%arg0: i32) -> (i32, i32) {
    %c0_i32 = arith.constant 0 : i32
    %c0_i32_0 = arith.constant 0 : i32
    return %c0_i32, %arg0 : i32, i32
  }
  func.func @transform_2(%arg0: i32) -> (i32, i32) {
    %c0_i32 = arith.constant 0 : i32
    %c0_i32_0 = arith.constant 0 : i32
    return %c0_i32, %arg0 : i32, i32
  }
}

</mosaic_0001>

<bundles_post_ra>
// kernel: tpu_custom_call.1
= control target key start
LH: loop header
LB: loop body
LE: loop exit
PB: predicated region body
PF: predicated region fallthrough
CT: control target
= control target key end

     0   :  { %7 = vsyncpa [#allocation3], 0  ;;  %s521_s0 = inlined_call_operand.hbm [shape: bf16[8,256], index: 0, kind: input, shape index: {}]   ;;  %s522_s1 = inlined_call_operand.hbm [shape: bf16[256,256], index: 1, kind: input, shape index: {}]   ;;  %s523_s2 = inlined_call_operand.hbm [shape: f32[8,256], index: 2, kind: output, shape index: {}]  }
   0x1   :  { %8 = vsyncpa [#allocation6], 0 }
   0x2   :  { %9 = vsyncpa [#allocation4], 0  ;;  %s458_s9 = smov [#allocation2]   ;;  %s459_s11 = smov [#allocation5]  }
   0x3   :  { %s16_s10 = sshll.u32 %s458_s9, 4  ;;  %s25_s12 = sshll.u32 %s459_s11, 4  ;;  %s17_s10 = int_to_ptr.vmem [resolvable:$true] %s16_s10  ;;  %s478_s12 = int_to_ptr.vmem [resolvable:$true] %s25_s12 }
   0x4   :  { %s386_s15 = scalar_lea.hbm %s521_s0, 128 }
   0x5   :  { %p387_p0 = scmp.ne.s32.totalorder %s521_s0, %s386_s15  ;;  %p390_p1 = scmp.lt.u32.totalorder %s386_s15, %s521_s0 }
   0x7   :  { %p392_p2 = pnand %p390_p1, %p387_p0 }
   0x9   :  { %395 = shalt.err (!%p392_p2)
}
   0xa   :  { %s396_s20 = scalar_lea.vmem %s17_s10, 128  ;;  %p401_p4 = scmp.lt.s32.totalorder %s17_s10, %s17_s10 }
   0xb   :  { %p397_p3 = scmp.ne.s32.totalorder %s17_s10, %s396_s20  ;;  %p402_p5 = scmp.lt.s32.totalorder %s396_s20, %s396_s20 }
   0xd   :  { %p403_p6 = por %p402_p5, %p401_p4 }
   0xf   :  { %p404_p7 = pnand %p403_p6, %p397_p3 }
  0x11   :  { %407 = shalt.err (!%p404_p7)
}
  0x12   :  { %19 = dma.hbm_to_vmem [thread:$0]  %s521_s0, 128, %s17_s10, [#allocation3]  }
  0x13   :  { %s408_s25 = scalar_lea.hbm %s522_s1, 4096 }
  0x14   :  { %p409_p8 = scmp.ne.s32.totalorder %s522_s1, %s408_s25  ;;  %p412_p9 = scmp.lt.u32.totalorder %s408_s25, %s522_s1 }
  0x16   :  { %p414_p10 = pnand %p412_p9, %p409_p8 }
  0x18   :  { %417 = shalt.err (!%p414_p10)
}
  0x19   :  { %s418_s30 = scalar_lea.vmem %s478_s12, 4096  ;;  %p423_p12 = scmp.lt.s32.totalorder %s478_s12, %s478_s12 }
  0x1a   :  { %p419_p11 = scmp.ne.s32.totalorder %s478_s12, %s418_s30  ;;  %p424_p13 = scmp.lt.s32.totalorder %s418_s30, %s418_s30 }
  0x1c   :  { %p425_p0 = por %p424_p13, %p423_p12 }
  0x1e   :  { %p426_p1 = pnand %p425_p0, %p419_p11 }
  0x20   :  { %429 = shalt.err (!%p426_p1)
}
  0x21   :  { %s460_s0 = smov 128   ;;  %s461_s3 = smov 8  }
  0x22   :  { %31 = dma.hbm_to_vmem [thread:$0]  %s522_s1, 4096, %s478_s12, [#allocation6], %s460_s0, %s460_s0, %s461_s3  }
  0x23   :  { %452 = dma.done.wait [#allocation3], 128  }
  0x24   :  { %453 = vsyncadd [#allocation3], 4294967168 }
  0x25   :  { %454 = dma.done.wait [#allocation6], 4096  }
  0x26   :  { %455 = vsyncadd [#allocation6], 4294963200  ;;  %v336_v0 = vld [vmem:[#allocation5 + $0x4] ss:$8 sps:$4 sm:$0xff]   ;;  %v338_v1 = vld [vmem:[#allocation5] ss:$8 sps:$4 sm:$0xff]  }
  0x27   :  { %238 = vmatprep.subr.bf16.mxu0 %v336_v0  ;;  %v339_v2 = vld [vmem:[#allocation5 + $0x14] ss:$8 sps:$4 sm:$0xff]   ;;  %v341_v3 = vld [vmem:[#allocation5 + $0x10] ss:$8 sps:$4 sm:$0xff]   ;;  %v342_v4 = vld [vmem:[#allocation5 + $0x24] ss:$8 sps:$4 sm:$0xff]  }
  0x28   :  { %239 = vmatpush1.bf16.msra.mxu0 %v338_v1  ;;  %v344_v5 = vld [vmem:[#allocation5 + $0x20] ss:$8 sps:$4 sm:$0xff]   ;;  %v345_v6 = vld [vmem:[#allocation5 + $0x34] ss:$8 sps:$4 sm:$0xff]   ;;  %v347_v7 = vld [vmem:[#allocation5 + $0x30] ss:$8 sps:$4 sm:$0xff]  }
  0x29   :  { %240 = vmatprep.subr.bf16.mxu0 %v339_v2  ;;  %v348_v8 = vld [vmem:[#allocation5 + $0x44] ss:$8 sps:$4 sm:$0xff]   ;;  %v350_v9 = vld [vmem:[#allocation5 + $0x40] ss:$8 sps:$4 sm:$0xff]   ;;  %v351_v10 = vld [vmem:[#allocation5 + $0x54] ss:$8 sps:$4 sm:$0xff]  }
  0x2a   :  { %v353_v11 = vld [vmem:[#allocation5 + $0x50] ss:$8 sps:$4 sm:$0xff]   ;;  %v354_v12 = vld [vmem:[#allocation5 + $0x64] ss:$8 sps:$4 sm:$0xff]   ;;  %v356_v15 = vld [vmem:[#allocation5 + $0x60] ss:$8 sps:$4 sm:$0xff]  }
  0x2b   :  { %v38_v13 = vld [vmem:[#allocation2] sm:$0xff]  ;;  %v360_v18 = vld [vmem:[#allocation5 + $0x84] ss:$8 sps:$4 sm:$0xff]   ;;  %v362_v19 = vld [vmem:[#allocation5 + $0x80] ss:$8 sps:$4 sm:$0xff]   ;;  %s462_s1 = smov [#allocation7]  }
  0x2c   :  { %241 = vmatpush1.bf16.msra.mxu0 %v341_v3  ;;  %v298_v14 = vcombine.high %v38_v13, %v38_v13  ;;  %v357_v16 = vld [vmem:[#allocation5 + $0x74] ss:$8 sps:$4 sm:$0xff]   ;;  %v359_v17 = vld [vmem:[#allocation5 + $0x70] ss:$8 sps:$4 sm:$0xff]   ;;  %v366_v22 = vld [vmem:[#allocation5 + $0xa4] ss:$8 sps:$4 sm:$0xff]   ;;  %v297_v34 = vcombine.low %v38_v13, %v38_v13 }
  0x2d   :  { %242 = vmatprep.subr.bf16.mxu0 %v342_v4  ;;  %v363_v20 = vld [vmem:[#allocation5 + $0x94] ss:$8 sps:$4 sm:$0xff]   ;;  %v365_v21 = vld [vmem:[#allocation5 + $0x90] ss:$8 sps:$4 sm:$0xff]   ;;  %v368_v23 = vld [vmem:[#allocation5 + $0xa0] ss:$8 sps:$4 sm:$0xff]  }
  0x2e   :  { %270 = vmatprep.mubr.bf16.mxu0 %v298_v14  ;;  %v369_v24 = vld [vmem:[#allocation5 + $0xb4] ss:$8 sps:$4 sm:$0xff]   ;;  %v371_v25 = vld [vmem:[#allocation5 + $0xb0] ss:$8 sps:$4 sm:$0xff]   ;;  %v372_v26 = vld [vmem:[#allocation5 + $0xc4] ss:$8 sps:$4 sm:$0xff]  }
  0x2f   :  { %v374_v27 = vld [vmem:[#allocation5 + $0xc0] ss:$8 sps:$4 sm:$0xff]   ;;  %v375_v28 = vld [vmem:[#allocation5 + $0xd4] ss:$8 sps:$4 sm:$0xff]   ;;  %v377_v29 = vld [vmem:[#allocation5 + $0xd0] ss:$8 sps:$4 sm:$0xff]  }
  0x30   :  { %243 = vmatpush1.bf16.msra.mxu0 %v344_v5  ;;  %v378_v30 = vld [vmem:[#allocation5 + $0xe4] ss:$8 sps:$4 sm:$0xff]   ;;  %v380_v31 = vld [vmem:[#allocation5 + $0xe0] ss:$8 sps:$4 sm:$0xff]   ;;  %v381_v32 = vld [vmem:[#allocation5 + $0xf4] ss:$8 sps:$4 sm:$0xff]  }
  0x31   :  { %244 = vmatprep.subr.bf16.mxu0 %v345_v6  ;;  %v383_v33 = vld [vmem:[#allocation5 + $0xf0] ss:$8 sps:$4 sm:$0xff]   ;;  %s287_s6 = sshll.u32 %s462_s1, 4  ;;  %s288_s6 = int_to_ptr.vmem [resolvable:$true] %s287_s6 }
  0x32   :  { %s430_s7 = scalar_lea.vmem %s288_s6, 256  ;;  %p435_p3 = scmp.lt.s32.totalorder %s288_s6, %s288_s6 }
  0x33   :  { %p431_p2 = scmp.ne.s32.totalorder %s288_s6, %s430_s7  ;;  %p436_p4 = scmp.lt.s32.totalorder %s430_s7, %s430_s7 }
  0x34   :  { %245 = vmatpush1.bf16.msra.mxu0 %v347_v7 }
  0x35   :  { %246 = vmatprep.subr.bf16.mxu0 %v348_v8  ;;  %p437_p5 = por %p436_p4, %p435_p3 }
  0x37   :  { %p438_p6 = pnand %p437_p5, %p431_p2 }
  0x38   :  { %247 = vmatpush1.bf16.msra.mxu0 %v350_v9 }
  0x39   :  { %248 = vmatprep.subr.bf16.mxu0 %v351_v10 }
  0x3c   :  { %249 = vmatpush1.bf16.msra.mxu0 %v353_v11 }
  0x3d   :  { %250 = vmatprep.subr.bf16.mxu0 %v354_v12 }
  0x40   :  { %251 = vmatpush1.bf16.msra.mxu0 %v356_v15 }
  0x41   :  { %252 = vmatprep.subr.bf16.mxu0 %v357_v16 }
  0x44   :  { %253 = vmatpush1.bf16.msra.mxu0 %v359_v17 }
  0x45   :  { %254 = vmatprep.subr.bf16.mxu0 %v360_v18 }
  0x48   :  { %255 = vmatpush1.bf16.msra.mxu0 %v362_v19 }
  0x49   :  { %256 = vmatprep.subr.bf16.mxu0 %v363_v20 }
  0x4c   :  { %257 = vmatpush1.bf16.msra.mxu0 %v365_v21 }
  0x4d   :  { %258 = vmatprep.subr.bf16.mxu0 %v366_v22 }
  0x50   :  { %259 = vmatpush1.bf16.msra.mxu0 %v368_v23 }
  0x51   :  { %260 = vmatprep.subr.bf16.mxu0 %v369_v24 }
  0x54   :  { %261 = vmatpush1.bf16.msra.mxu0 %v371_v25 }
  0x55   :  { %262 = vmatprep.subr.bf16.mxu0 %v372_v26 }
  0x58   :  { %263 = vmatpush1.bf16.msra.mxu0 %v374_v27 }
  0x59   :  { %264 = vmatprep.subr.bf16.mxu0 %v375_v28 }
  0x5c   :  { %265 = vmatpush1.bf16.msra.mxu0 %v377_v29 }
  0x5d   :  { %266 = vmatprep.subr.bf16.mxu0 %v378_v30 }
  0x60   :  { %267 = vmatpush1.bf16.msra.mxu0 %v380_v31 }
  0x61   :  { %268 = vmatprep.subr.bf16.mxu0 %v381_v32 }
  0x64   :  { %269 = vmatpush1.bf16.msra.mxu0 %v383_v33 }
  0x67   :  { %271 = vmatmul.mubr.bf16.vlgmr.msra.gmra.mrb[0].mxu0 %v297_v34 }
 0x13a   :  { %v272_v35 = vpop.f32.mrb[0].mxu0 }
 0x13b   :  { %279 = vst [vmem:[#allocation7] sm:$0xff] %v272_v35  ;;  %v274_v36 = vpop.f32.mrb[1].mxu0 }
 0x13c   :  { %280 = vst [vmem:[#allocation7 + $0x8] sm:$0xff] %v274_v36  ;;  %v276_v37 = vpop.f32.mrb[2].mxu0 }
 0x13d   :  { %v277_v38 = vpop.f32.mrb[3].mxu0 }
 0x13e   :  { %441 = shalt.err (!%p438_p6)
}
 0x13f   :  { %s442_s10 = scalar_lea.hbm %s523_s2, 256 }
 0x140   :  { %p443_p7 = scmp.ne.s32.totalorder %s523_s2, %s442_s10  ;;  %p446_p8 = scmp.lt.u32.totalorder %s442_s10, %s523_s2 }
 0x142   :  { %p448_p9 = pnand %p446_p8, %p443_p7 }
 0x144   :  { %451 = shalt.err (!%p448_p9)
}
 0x145   :  { %290 = dma.vmem_to_hbm [thread:$0]  %s288_s6, 256, %s523_s2, [#allocation4]  }
 0x146   :  { %456 = dma.done.wait [#allocation4], 256  }
 0x147   :  { %457 = vsyncadd [#allocation4], 4294967040 }
 0x148   :  { %294 = vsyncpa [#allocation3], 1 }
 0x149   :  { %295 = vsyncpa [#allocation6], 1 }
 0x14a   :  { %296 = vsyncpa [#allocation4], 1 }

</bundles_post_ra>
